<compile_context>
chip_gen: v5e
topology: v5e:2x2
jax: 0.10.0
libtpu: 0.0.40
codegen_flags: <defaults>
</compile_context>

<pallas_src>
import functools

import jax
import jax.numpy as jnp
from jax.experimental import pallas as pl
from jax.experimental.pallas import tpu as pltpu


def _round_up(x, m):
    return (x + m - 1) // m * m


def _se_kernel(x_ref, w1_ref, b1_ref, w2_ref, b2_ref, o_ref, *, cg, hw):
    # x_ref : (Bt, Ct, HW)         batch/group chunk, Ct = Gt * cg, HW = full spatial
    # w1_ref: (Gt, cg, hidden)     fc1 weight stored (in, out)
    # b1_ref: (Gt, 1, hidden)
    # w2_ref: (Gt, cg, hidden)     fc2 weight, rows = out channel
    # b2_ref: (Gt, cg, 1)
    # o_ref : (Bt, Ct, HW)
    gt = w1_ref.shape[0]
    inv_hw = jnp.float32(1.0 / hw)

    # Pass 1: global average pool over spatial lanes.  Block last dim == full
    # HW, so the logical-shape reduce never sees padded tail lanes; accumulate
    # in f32 without upcasting the whole block.
    pooled = jnp.sum(x_ref[...], axis=-1, keepdims=True, dtype=jnp.float32) * inv_hw
    # pooled: (Bt, Ct, 1) with channels on sublanes.

    # Tiny per-group excite MLP on VPU/EUP (an MXU pass would be pure waste).
    # Hoist weight loads + casts once.
    w1 = w1_ref[...].astype(jnp.float32)   # (Gt, cg, hidden)
    b1 = b1_ref[...].astype(jnp.float32)   # (Gt, 1, hidden)
    w2 = w2_ref[...].astype(jnp.float32)   # (Gt, cg, hidden)
    b2 = b2_ref[...].astype(jnp.float32)   # (Gt, cg, 1)

    scales = []
    for g in range(gt):                    # static, Gt is small
        pg = pooled[:, g * cg:(g + 1) * cg, :]               # (Bt, cg, 1)
        h = jnp.sum(pg * w1[g][None], axis=1) + b1[g]        # (Bt, hidden)
        h = jnp.maximum(h, 0.0)                              # ReLU
        yg = jnp.sum(w2[g][None] * h[:, None, :], axis=-1,
                     keepdims=True) + b2[g][None]            # (Bt, cg, 1)
        scales.append(jax.nn.sigmoid(yg))
    y = scales[0] if gt == 1 else jnp.concatenate(scales, axis=1)  # (Bt, Ct, 1)

    # Pass 2: rescale.  Re-read x from VMEM (keeps vreg pressure flat) and
    # multiply in the input dtype: cast the tiny y, not the big block.
    y = y.astype(o_ref.dtype)
    o_ref[...] = x_ref[...] * y


def _pick_tiles(B, G, Cg, HW, itemsize, target_bytes=4 << 20):
    """Pick (batch tile, group tile) so blocks are ~target and the grid has
    enough steps for the pipeline / both v7x TensorCores."""
    sub = max(8, 32 // max(itemsize, 1))        # sublane multiple: 8 f32, 16 bf16
    hw_pad = _round_up(HW, 128)
    C = G * Cg

    def block_bytes(bt, gt):
        return bt * _round_up(gt * Cg, sub) * hw_pad * itemsize

    def ct_ok(gt):
        ct = gt * Cg
        return ct == C or ct % sub == 0          # BlockSpec sublane-dim rule

    # Prefer all groups in one block (weights stay VMEM-resident); fall back
    # to group-axis tiling when one batch element exceeds the target (keeps
    # blocks small enough for v7x's 64 MiB VMEM on huge C*HW).
    gt = G
    if block_bytes(1, G) > target_bytes:
        fits = [g for g in range(1, G) if G % g == 0 and ct_ok(g)
                and block_bytes(1, g) <= target_bytes]
        if fits:
            gt = max(fits)
        else:
            legal = [g for g in range(1, G) if G % g == 0 and ct_ok(g)]
            gt = min(legal) if legal else G
            # NOTE: for extreme C*HW a further spatial-axis tiling would be
            # needed; not required for typical SE-block shapes.

    ng = G // gt
    divs = [d for d in range(1, B + 1)
            if B % d == 0 and block_bytes(d, gt) <= target_bytes]
    if not divs:
        divs = [1]

    def steps(d):
        return (B // d) * ng

    bt = None
    # Prefer >=4 total steps with an even count (2 TCs on v7x, pipeline
    # steady-state on single-TC v5e/v6e); then >=4; then >=2; else biggest.
    for pred in (lambda d: steps(d) >= 4 and steps(d) % 2 == 0,
                 lambda d: steps(d) >= 4,
                 lambda d: steps(d) >= 2):
        cands = [d for d in divs if pred(d)]
        if cands:
            bt = max(cands)
            break
    if bt is None:
        bt = max(divs)
    return bt, gt


def group_se_block(x, w1t, b1, w2, b2, groups):
    """x: (B, C, H, W); per-group params stacked on a leading G axis."""
    B, C, H, W = x.shape
    G = groups
    Cg = C // G
    HW = H * W
    hidden = w1t.shape[-1]
    itemsize = jnp.dtype(x.dtype).itemsize

    # Dense sublane axis: collapse (G, Cg) -> C; no spatial padding (the block
    # last dim equals the full HW).  These reshapes are metadata-only.
    xg = x.reshape(B, C, HW)

    Bt, Gt = _pick_tiles(B, G, Cg, HW, itemsize)
    Ct = Gt * Cg
    grid = (B // Bt, G // Gt)

    # Honest VMEM accounting: in+out blocks double-buffered + weights, plus a
    # f32 pool temp of one block for sub-32-bit inputs.
    sub = max(8, 32 // max(itemsize, 1))
    hw_pad = _round_up(HW, 128)
    blk = Bt * _round_up(Ct, sub) * hw_pad * itemsize
    w_bytes = sum(int(a.size) * jnp.dtype(a.dtype).itemsize
                  for a in (w1t, b1, w2, b2))
    vmem_need = blk * 2 * 2 + w_bytes
    if itemsize < 4:
        vmem_need += Bt * _round_up(Ct, 8) * hw_pad * 4
    try:
        vmem_cap = int(pltpu.get_tpu_info().vmem_capacity_bytes)
    except Exception:
        vmem_cap = 64 << 20                      # conservative (v7x per-TC)
    vmem_limit = int(min(max(vmem_need + (8 << 20), 32 << 20),
                         vmem_cap - (12 << 20)))
    vmem_limit = int(max(vmem_limit, vmem_need + (2 << 20)))

    kernel = functools.partial(_se_kernel, cg=Cg, hw=float(HW))

    out = pl.pallas_call(
        kernel,
        out_shape=jax.ShapeDtypeStruct((B, C, HW), x.dtype),
        grid_spec=pltpu.PrefetchScalarGridSpec(
            num_scalar_prefetch=0,
            grid=grid,
            in_specs=[
                # x: batch-chunk x group-chunk, full spatial.
                pl.BlockSpec((Bt, Ct, HW), lambda i, j: (i, j, 0)),
                # Weights/biases: blocked only on the leading group axis; with
                # a single group chunk the index_map is constant -> resident.
                pl.BlockSpec((Gt, Cg, hidden), lambda i, j: (j, 0, 0)),
                pl.BlockSpec((Gt, 1, hidden), lambda i, j: (j, 0, 0)),
                pl.BlockSpec((Gt, Cg, hidden), lambda i, j: (j, 0, 0)),
                pl.BlockSpec((Gt, Cg, 1), lambda i, j: (j, 0, 0)),
            ],
            out_specs=pl.BlockSpec((Bt, Ct, HW), lambda i, j: (i, j, 0)),
        ),
        compiler_params=pltpu.CompilerParams(
            dimension_semantics=("parallel", "parallel"),
            vmem_limit_bytes=vmem_limit,
        ),
        cost_estimate=pl.CostEstimate(
            flops=int(3 * B * C * HW),
            transcendentals=int(B * C),
            bytes_accessed=int(2 * B * C * HW * itemsize + w_bytes),
        ),
        # input_output_aliases={0: 0} would save an HBM allocation if the
        # caller can donate x; left off to keep functional semantics.
    )(xg, w1t, b1, w2, b2)

    return out.reshape(B, C, H, W)


def reference_group_se(x, w1t, b1, w2, b2, groups):
    """Pure-JAX reference matching the PyTorch GroupSEBlock forward."""
    B, C, H, W = x.shape
    G = groups
    Cg = C // G
    xg = x.reshape(B, G, Cg, H * W)
    pooled = xg.mean(axis=-1)                                    # (B, G, Cg)
    h = jnp.einsum("bgc,gch->bgh", pooled, w1t) + b1[None, :, 0, :]
    h = jnp.maximum(h, 0.0)
    y = jnp.einsum("bgh,gch->bgc", h, w2) + b2[None, :, :, 0]
    y = jax.nn.sigmoid(y)
    out = xg * y[..., None]
    return out.reshape(B, C, H, W)


if __name__ == "__main__":
    # Small shapes consistent with the module:
    # channels=32, groups=4 -> channels_per_group=8; reduction=4 -> hidden=2
    B, C, H, W = 2, 32, 16, 16
    G = 4
    Cg = C // G
    reduction = 4
    hidden = Cg // reduction

    key = jax.random.PRNGKey(0)
    kx, kw1, kb1, kw2, kb2 = jax.random.split(key, 5)

    x = jax.random.normal(kx, (B, C, H, W), dtype=jnp.float32)

    # Deterministic per-group parameters (synthetic init, not a checkpoint).
    # fc1 weight stored transposed: (G, in=Cg, out=hidden); fc2: (G, out=Cg, in=hidden).
    w1t = 0.1 * jax.random.normal(kw1, (G, Cg, hidden), dtype=jnp.float32)
    b1 = 0.1 * jax.random.normal(kb1, (G, 1, hidden), dtype=jnp.float32)
    w2 = 0.1 * jax.random.normal(kw2, (G, Cg, hidden), dtype=jnp.float32)
    b2 = 0.1 * jax.random.normal(kb2, (G, Cg, 1), dtype=jnp.float32)

    out = jax.block_until_ready(group_se_block(x, w1t, b1, w2, b2, groups=G))

    ref = reference_group_se(x, w1t, b1, w2, b2, groups=G)
    assert out.shape == (B, C, H, W)
    assert jnp.allclose(out, ref, atol=1e-5, rtol=1e-5), "mismatch vs reference"

    print("KERNEL_OK")
</pallas_src>

<mosaic_0001>
module attributes {stable_mosaic.version = 11 : i64} {
  func.func @_se_kernel(%arg0: i32, %arg1: i32, %arg2: memref<1x32x256xf32, #tpu.memory_space<vmem>>, %arg3: memref<4x8x2xf32, #tpu.memory_space<vmem>>, %arg4: memref<4x1x2xf32, #tpu.memory_space<vmem>>, %arg5: memref<4x8x2xf32, #tpu.memory_space<vmem>>, %arg6: memref<4x8x1xf32, #tpu.memory_space<vmem>>, %arg7: memref<1x32x256xf32, #tpu.memory_space<vmem>>) attributes {dimension_semantics = [#tpu.dimension_semantics<parallel>, #tpu.dimension_semantics<parallel>], iteration_bounds = array<i64: 2, 1>, scalar_prefetch = 0 : i64, scratch_operands = 0 : i64, tpu.core_type = #tpu.core_type<tc>, window_params = [{transform_indices = @transform_0, window_bounds = array<i64: 1, 32, 256>}, {transform_indices = @transform_1, window_bounds = array<i64: 4, 8, 2>}, {transform_indices = @transform_2, window_bounds = array<i64: 4, 1, 2>}, {transform_indices = @transform_3, window_bounds = array<i64: 4, 8, 2>}, {transform_indices = @transform_4, window_bounds = array<i64: 4, 8, 1>}, {transform_indices = @transform_5, window_bounds = array<i64: 1, 32, 256>}]} {
    %c0 = arith.constant 0 : index
    %c0_0 = arith.constant 0 : index
    %c0_1 = arith.constant 0 : index
    %0 = vector.load %arg2[%c0, %c0_0, %c0_1] : memref<1x32x256xf32, #tpu.memory_space<vmem>>, vector<1x32x256xf32>
    %cst = arith.constant dense<0.000000e+00> : vector<1x32xf32>
    %1 = vector.multi_reduction <add>, %0, %cst [2] : vector<1x32x256xf32> to vector<1x32xf32>
    %2 = vector.shape_cast %1 : vector<1x32xf32> to vector<1x32x1xf32>
    %cst_2 = arith.constant 3.906250e-03 : f32
    %3 = vector.broadcast %cst_2 : f32 to vector<1x32x1xf32>
    %4 = arith.mulf %2, %3 : vector<1x32x1xf32>
    %c0_3 = arith.constant 0 : index
    %c0_4 = arith.constant 0 : index
    %c0_5 = arith.constant 0 : index
    %5 = vector.load %arg3[%c0_3, %c0_4, %c0_5] : memref<4x8x2xf32, #tpu.memory_space<vmem>>, vector<4x8x2xf32>
    %c0_6 = arith.constant 0 : index
    %c0_7 = arith.constant 0 : index
    %c0_8 = arith.constant 0 : index
    %6 = vector.load %arg4[%c0_6, %c0_7, %c0_8] : memref<4x1x2xf32, #tpu.memory_space<vmem>>, vector<4x1x2xf32>
    %c0_9 = arith.constant 0 : index
    %c0_10 = arith.constant 0 : index
    %c0_11 = arith.constant 0 : index
    %7 = vector.load %arg5[%c0_9, %c0_10, %c0_11] : memref<4x8x2xf32, #tpu.memory_space<vmem>>, vector<4x8x2xf32>
    %c0_12 = arith.constant 0 : index
    %c0_13 = arith.constant 0 : index
    %c0_14 = arith.constant 0 : index
    %8 = vector.load %arg6[%c0_12, %c0_13, %c0_14] : memref<4x8x1xf32, #tpu.memory_space<vmem>>, vector<4x8x1xf32>
    %9 = vector.extract_strided_slice %4 {offsets = [0, 0, 0], sizes = [1, 8, 1], strides = [1, 1, 1]} : vector<1x32x1xf32> to vector<1x8x1xf32>
    %10 = vector.extract_strided_slice %5 {offsets = [0, 0, 0], sizes = [1, 8, 2], strides = [1, 1, 1]} : vector<4x8x2xf32> to vector<1x8x2xf32>
    %11 = vector.shape_cast %10 : vector<1x8x2xf32> to vector<8x2xf32>
    %12 = vector.shape_cast %11 : vector<8x2xf32> to vector<1x8x2xf32>
    %13 = vector.broadcast %9 : vector<1x8x1xf32> to vector<1x8x2xf32>
    %14 = arith.mulf %13, %12 : vector<1x8x2xf32>
    %cst_15 = arith.constant dense<0.000000e+00> : vector<1x2xf32>
    %15 = vector.multi_reduction <add>, %14, %cst_15 [1] : vector<1x8x2xf32> to vector<1x2xf32>
    %16 = vector.extract_strided_slice %6 {offsets = [0, 0, 0], sizes = [1, 1, 2], strides = [1, 1, 1]} : vector<4x1x2xf32> to vector<1x1x2xf32>
    %17 = vector.shape_cast %16 : vector<1x1x2xf32> to vector<1x2xf32>
    %18 = arith.addf %15, %17 : vector<1x2xf32>
    %cst_16 = arith.constant 0.000000e+00 : f32
    %19 = vector.broadcast %cst_16 : f32 to vector<1x2xf32>
    %20 = arith.maximumf %18, %19 : vector<1x2xf32>
    %21 = vector.extract_strided_slice %7 {offsets = [0, 0, 0], sizes = [1, 8, 2], strides = [1, 1, 1]} : vector<4x8x2xf32> to vector<1x8x2xf32>
    %22 = vector.shape_cast %21 : vector<1x8x2xf32> to vector<8x2xf32>
    %23 = vector.shape_cast %22 : vector<8x2xf32> to vector<1x8x2xf32>
    %24 = vector.shape_cast %20 : vector<1x2xf32> to vector<1x1x2xf32>
    %25 = vector.broadcast %24 : vector<1x1x2xf32> to vector<1x8x2xf32>
    %26 = arith.mulf %23, %25 : vector<1x8x2xf32>
    %cst_17 = arith.constant dense<0.000000e+00> : vector<1x8xf32>
    %27 = vector.multi_reduction <add>, %26, %cst_17 [2] : vector<1x8x2xf32> to vector<1x8xf32>
    %28 = vector.shape_cast %27 : vector<1x8xf32> to vector<1x8x1xf32>
    %29 = vector.extract_strided_slice %8 {offsets = [0, 0, 0], sizes = [1, 8, 1], strides = [1, 1, 1]} : vector<4x8x1xf32> to vector<1x8x1xf32>
    %30 = vector.shape_cast %29 : vector<1x8x1xf32> to vector<8x1xf32>
    %31 = vector.shape_cast %30 : vector<8x1xf32> to vector<1x8x1xf32>
    %32 = arith.addf %28, %31 : vector<1x8x1xf32>
    %33 = arith.negf %32 : vector<1x8x1xf32>
    %34 = math.exp %33 : vector<1x8x1xf32>
    %cst_18 = arith.constant 1.000000e+00 : f32
    %35 = vector.broadcast %cst_18 : f32 to vector<1x8x1xf32>
    %36 = arith.addf %35, %34 : vector<1x8x1xf32>
    %37 = arith.divf %35, %36 : vector<1x8x1xf32>
    %38 = vector.extract_strided_slice %4 {offsets = [0, 8, 0], sizes = [1, 8, 1], strides = [1, 1, 1]} : vector<1x32x1xf32> to vector<1x8x1xf32>
    %39 = vector.extract_strided_slice %5 {offsets = [1, 0, 0], sizes = [1, 8, 2], strides = [1, 1, 1]} : vector<4x8x2xf32> to vector<1x8x2xf32>
    %40 = vector.shape_cast %39 : vector<1x8x2xf32> to vector<8x2xf32>
    %41 = vector.shape_cast %40 : vector<8x2xf32> to vector<1x8x2xf32>
    %42 = vector.broadcast %38 : vector<1x8x1xf32> to vector<1x8x2xf32>
    %43 = arith.mulf %42, %41 : vector<1x8x2xf32>
    %cst_19 = arith.constant dense<0.000000e+00> : vector<1x2xf32>
    %44 = vector.multi_reduction <add>, %43, %cst_19 [1] : vector<1x8x2xf32> to vector<1x2xf32>
    %45 = vector.extract_strided_slice %6 {offsets = [1, 0, 0], sizes = [1, 1, 2], strides = [1, 1, 1]} : vector<4x1x2xf32> to vector<1x1x2xf32>
    %46 = vector.shape_cast %45 : vector<1x1x2xf32> to vector<1x2xf32>
    %47 = arith.addf %44, %46 : vector<1x2xf32>
    %cst_20 = arith.constant 0.000000e+00 : f32
    %48 = vector.broadcast %cst_20 : f32 to vector<1x2xf32>
    %49 = arith.maximumf %47, %48 : vector<1x2xf32>
    %50 = vector.extract_strided_slice %7 {offsets = [1, 0, 0], sizes = [1, 8, 2], strides = [1, 1, 1]} : vector<4x8x2xf32> to vector<1x8x2xf32>
    %51 = vector.shape_cast %50 : vector<1x8x2xf32> to vector<8x2xf32>
    %52 = vector.shape_cast %51 : vector<8x2xf32> to vector<1x8x2xf32>
    %53 = vector.shape_cast %49 : vector<1x2xf32> to vector<1x1x2xf32>
    %54 = vector.broadcast %53 : vector<1x1x2xf32> to vector<1x8x2xf32>
    %55 = arith.mulf %52, %54 : vector<1x8x2xf32>
    %cst_21 = arith.constant dense<0.000000e+00> : vector<1x8xf32>
    %56 = vector.multi_reduction <add>, %55, %cst_21 [2] : vector<1x8x2xf32> to vector<1x8xf32>
    %57 = vector.shape_cast %56 : vector<1x8xf32> to vector<1x8x1xf32>
    %58 = vector.extract_strided_slice %8 {offsets = [1, 0, 0], sizes = [1, 8, 1], strides = [1, 1, 1]} : vector<4x8x1xf32> to vector<1x8x1xf32>
    %59 = vector.shape_cast %58 : vector<1x8x1xf32> to vector<8x1xf32>
    %60 = vector.shape_cast %59 : vector<8x1xf32> to vector<1x8x1xf32>
    %61 = arith.addf %57, %60 : vector<1x8x1xf32>
    %62 = arith.negf %61 : vector<1x8x1xf32>
    %63 = math.exp %62 : vector<1x8x1xf32>
    %cst_22 = arith.constant 1.000000e+00 : f32
    %64 = vector.broadcast %cst_22 : f32 to vector<1x8x1xf32>
    %65 = arith.addf %64, %63 : vector<1x8x1xf32>
    %66 = arith.divf %64, %65 : vector<1x8x1xf32>
    %67 = vector.extract_strided_slice %4 {offsets = [0, 16, 0], sizes = [1, 8, 1], strides = [1, 1, 1]} : vector<1x32x1xf32> to vector<1x8x1xf32>
    %68 = vector.extract_strided_slice %5 {offsets = [2, 0, 0], sizes = [1, 8, 2], strides = [1, 1, 1]} : vector<4x8x2xf32> to vector<1x8x2xf32>
    %69 = vector.shape_cast %68 : vector<1x8x2xf32> to vector<8x2xf32>
    %70 = vector.shape_cast %69 : vector<8x2xf32> to vector<1x8x2xf32>
    %71 = vector.broadcast %67 : vector<1x8x1xf32> to vector<1x8x2xf32>
    %72 = arith.mulf %71, %70 : vector<1x8x2xf32>
    %cst_23 = arith.constant dense<0.000000e+00> : vector<1x2xf32>
    %73 = vector.multi_reduction <add>, %72, %cst_23 [1] : vector<1x8x2xf32> to vector<1x2xf32>
    %74 = vector.extract_strided_slice %6 {offsets = [2, 0, 0], sizes = [1, 1, 2], strides = [1, 1, 1]} : vector<4x1x2xf32> to vector<1x1x2xf32>
    %75 = vector.shape_cast %74 : vector<1x1x2xf32> to vector<1x2xf32>
    %76 = arith.addf %73, %75 : vector<1x2xf32>
    %cst_24 = arith.constant 0.000000e+00 : f32
    %77 = vector.broadcast %cst_24 : f32 to vector<1x2xf32>
    %78 = arith.maximumf %76, %77 : vector<1x2xf32>
    %79 = vector.extract_strided_slice %7 {offsets = [2, 0, 0], sizes = [1, 8, 2], strides = [1, 1, 1]} : vector<4x8x2xf32> to vector<1x8x2xf32>
    %80 = vector.shape_cast %79 : vector<1x8x2xf32> to vector<8x2xf32>
    %81 = vector.shape_cast %80 : vector<8x2xf32> to vector<1x8x2xf32>
    %82 = vector.shape_cast %78 : vector<1x2xf32> to vector<1x1x2xf32>
    %83 = vector.broadcast %82 : vector<1x1x2xf32> to vector<1x8x2xf32>
    %84 = arith.mulf %81, %83 : vector<1x8x2xf32>
    %cst_25 = arith.constant dense<0.000000e+00> : vector<1x8xf32>
    %85 = vector.multi_reduction <add>, %84, %cst_25 [2] : vector<1x8x2xf32> to vector<1x8xf32>
    %86 = vector.shape_cast %85 : vector<1x8xf32> to vector<1x8x1xf32>
    %87 = vector.extract_strided_slice %8 {offsets = [2, 0, 0], sizes = [1, 8, 1], strides = [1, 1, 1]} : vector<4x8x1xf32> to vector<1x8x1xf32>
    %88 = vector.shape_cast %87 : vector<1x8x1xf32> to vector<8x1xf32>
    %89 = vector.shape_cast %88 : vector<8x1xf32> to vector<1x8x1xf32>
    %90 = arith.addf %86, %89 : vector<1x8x1xf32>
    %91 = arith.negf %90 : vector<1x8x1xf32>
    %92 = math.exp %91 : vector<1x8x1xf32>
    %cst_26 = arith.constant 1.000000e+00 : f32
    %93 = vector.broadcast %cst_26 : f32 to vector<1x8x1xf32>
    %94 = arith.addf %93, %92 : vector<1x8x1xf32>
    %95 = arith.divf %93, %94 : vector<1x8x1xf32>
    %96 = vector.extract_strided_slice %4 {offsets = [0, 24, 0], sizes = [1, 8, 1], strides = [1, 1, 1]} : vector<1x32x1xf32> to vector<1x8x1xf32>
    %97 = vector.extract_strided_slice %5 {offsets = [3, 0, 0], sizes = [1, 8, 2], strides = [1, 1, 1]} : vector<4x8x2xf32> to vector<1x8x2xf32>
    %98 = vector.shape_cast %97 : vector<1x8x2xf32> to vector<8x2xf32>
    %99 = vector.shape_cast %98 : vector<8x2xf32> to vector<1x8x2xf32>
    %100 = vector.broadcast %96 : vector<1x8x1xf32> to vector<1x8x2xf32>
    %101 = arith.mulf %100, %99 : vector<1x8x2xf32>
    %cst_27 = arith.constant dense<0.000000e+00> : vector<1x2xf32>
    %102 = vector.multi_reduction <add>, %101, %cst_27 [1] : vector<1x8x2xf32> to vector<1x2xf32>
    %103 = vector.extract_strided_slice %6 {offsets = [3, 0, 0], sizes = [1, 1, 2], strides = [1, 1, 1]} : vector<4x1x2xf32> to vector<1x1x2xf32>
    %104 = vector.shape_cast %103 : vector<1x1x2xf32> to vector<1x2xf32>
    %105 = arith.addf %102, %104 : vector<1x2xf32>
    %cst_28 = arith.constant 0.000000e+00 : f32
    %106 = vector.broadcast %cst_28 : f32 to vector<1x2xf32>
    %107 = arith.maximumf %105, %106 : vector<1x2xf32>
    %108 = vector.extract_strided_slice %7 {offsets = [3, 0, 0], sizes = [1, 8, 2], strides = [1, 1, 1]} : vector<4x8x2xf32> to vector<1x8x2xf32>
    %109 = vector.shape_cast %108 : vector<1x8x2xf32> to vector<8x2xf32>
    %110 = vector.shape_cast %109 : vector<8x2xf32> to vector<1x8x2xf32>
    %111 = vector.shape_cast %107 : vector<1x2xf32> to vector<1x1x2xf32>
    %112 = vector.broadcast %111 : vector<1x1x2xf32> to vector<1x8x2xf32>
    %113 = arith.mulf %110, %112 : vector<1x8x2xf32>
    %cst_29 = arith.constant dense<0.000000e+00> : vector<1x8xf32>
    %114 = vector.multi_reduction <add>, %113, %cst_29 [2] : vector<1x8x2xf32> to vector<1x8xf32>
    %115 = vector.shape_cast %114 : vector<1x8xf32> to vector<1x8x1xf32>
    %116 = vector.extract_strided_slice %8 {offsets = [3, 0, 0], sizes = [1, 8, 1], strides = [1, 1, 1]} : vector<4x8x1xf32> to vector<1x8x1xf32>
    %117 = vector.shape_cast %116 : vector<1x8x1xf32> to vector<8x1xf32>
    %118 = vector.shape_cast %117 : vector<8x1xf32> to vector<1x8x1xf32>
    %119 = arith.addf %115, %118 : vector<1x8x1xf32>
    %120 = arith.negf %119 : vector<1x8x1xf32>
    %121 = math.exp %120 : vector<1x8x1xf32>
    %cst_30 = arith.constant 1.000000e+00 : f32
    %122 = vector.broadcast %cst_30 : f32 to vector<1x8x1xf32>
    %123 = arith.addf %122, %121 : vector<1x8x1xf32>
    %124 = arith.divf %122, %123 : vector<1x8x1xf32>
    %125 = tpu.concatenate %37, %66, %95, %124 in 1 : vector<1x8x1xf32>, vector<1x8x1xf32>, vector<1x8x1xf32>, vector<1x8x1xf32> -> vector<1x32x1xf32>
    %c0_31 = arith.constant 0 : index
    %c0_32 = arith.constant 0 : index
    %c0_33 = arith.constant 0 : index
    %126 = vector.load %arg2[%c0_31, %c0_32, %c0_33] : memref<1x32x256xf32, #tpu.memory_space<vmem>>, vector<1x32x256xf32>
    %127 = vector.broadcast %125 : vector<1x32x1xf32> to vector<1x32x256xf32>
    %128 = arith.mulf %126, %127 : vector<1x32x256xf32>
    %c0_34 = arith.constant 0 : index
    %c0_35 = arith.constant 0 : index
    %c0_36 = arith.constant 0 : index
    %129 = vector.load %arg7[%c0_34, %c0_35, %c0_36] : memref<1x32x256xf32, #tpu.memory_space<vmem>>, vector<1x32x256xf32>
    tpu.vector_store %arg7[%c0_34, %c0_35, %c0_36], %128 {strides = array<i32>} : memref<1x32x256xf32, #tpu.memory_space<vmem>>, vector<1x32x256xf32>,
    return
  }
  func.func @transform_0(%arg0: i32, %arg1: i32) -> (i32, i32, i32) {
    %c0_i32 = arith.constant 0 : i32
    %c0_i32_0 = arith.constant 0 : i32
    return %arg0, %arg1, %c0_i32 : i32, i32, i32
  }
  func.func @transform_1(%arg0: i32, %arg1: i32) -> (i32, i32, i32) {
    %c0_i32 = arith.constant 0 : i32
    %c0_i32_0 = arith.constant 0 : i32
    %c0_i32_1 = arith.constant 0 : i32
    return %arg1, %c0_i32, %c0_i32_0 : i32, i32, i32
  }
  func.func @transform_2(%arg0: i32, %arg1: i32) -> (i32, i32, i32) {
    %c0_i32 = arith.constant 0 : i32
    %c0_i32_0 = arith.constant 0 : i32
    %c0_i32_1 = arith.constant 0 : i32
    return %arg1, %c0_i32, %c0_i32_0 : i32, i32, i32
  }
  func.func @transform_3(%arg0: i32, %arg1: i32) -> (i32, i32, i32) {
    %c0_i32 = arith.constant 0 : i32
    %c0_i32_0 = arith.constant 0 : i32
    %c0_i32_1 = arith.constant 0 : i32
    return %arg1, %c0_i32, %c0_i32_0 : i32, i32, i32
  }
  func.func @transform_4(%arg0: i32, %arg1: i32) -> (i32, i32, i32) {
    %c0_i32 = arith.constant 0 : i32
    %c0_i32_0 = arith.constant 0 : i32
    %c0_i32_1 = arith.constant 0 : i32
    return %arg1, %c0_i32, %c0_i32_0 : i32, i32, i32
  }
  func.func @transform_5(%arg0: i32, %arg1: i32) -> (i32, i32, i32) {
    %c0_i32 = arith.constant 0 : i32
    %c0_i32_0 = arith.constant 0 : i32
    return %arg0, %arg1, %c0_i32 : i32, i32, i32
  }
}

</mosaic_0001>

<bundles_post_ra>
// kernel: tpu_custom_call.1
= control target key start
LH: loop header
LB: loop body
LE: loop exit
PB: predicated region body
PF: predicated region fallthrough
CT: control target
= control target key end

     0   :  { %10 = vsyncpa [#allocation3], 0  ;;  %s1203_s0 = inlined_call_operand.hbm [shape: f32[2,32,256], index: 0, kind: input, shape index: {}]   ;;  %s1204_s1 = inlined_call_operand.vmem [shape: f32[4,8,2], index: 1, kind: input, shape index: {}]   ;;  %s1205_s2 = inlined_call_operand.vmem [shape: f32[4,1,2], index: 2, kind: input, shape index: {}]   ;;  %s1206_s3 = inlined_call_operand.vmem [shape: f32[4,8,2], index: 3, kind: input, shape index: {}]   ;;  %s1207_s4 = inlined_call_operand.vmem [shape: f32[4,8,1], index: 4, kind: input, shape index: {}]   ;;  %s1208_s5 = inlined_call_operand.hbm [shape: f32[2,32,256], index: 5, kind: output, shape index: {}]  }
   0x1   :  { %12 = vsyncpa [#allocation3 + $0x1], 0 }
   0x2   :  { %13 = vsyncpa [#allocation4], 0 }
   0x3   :  { %15 = vsyncpa [#allocation4 + $0x1], 0  ;;  %s991_s18 = smov 0   ;;  %s993_s19 = smov 0  }
   0x4   :  { %s995_s20 = smov 0   ;;  %s997_s21 = smov 0  }
   0x5   :  { %s999_s22 = smov 0   ;;  %s1001_s23 = smov 0  }
   0x6 LB: > { %s731_s24 = sadd.s32 4294967295, %s954_s23   ;;  %s732_s25 = sadd.s32 4294967294, %s954_s23   ;;  %s954_s23 = sphi %s1001_s23, %s21_s23   ;;  %s950_s22 = sphi %s999_s22, %s1217_s22   ;;  %s946_s21 = sphi %s997_s21, %s1216_s21   ;;  %s942_s20 = sphi %s995_s20, %s1215_s20   ;;  %s938_s19 = sphi %s993_s19, %s1214_s19   ;;  %s934_s18 = sphi %s991_s18, %s1213_s18  }
   0x7   : > { %s33_s26 = sadd.s32 1, %s950_s22  ;;  %s42_s27 = sadd.s32 1, %s942_s20 }
   0x8   : > { %p35_p0 = scmp.ge.s32.totalorder %s33_s26, 2  ;;  %p49_p1 = scmp.ne.s32.totalorder %s942_s20, %s938_s19 }
   0x9   : > { %p50_p2 = scmp.eq.s32.totalorder %s954_s23, 0  ;;  %p55_p3 = scmp.ne.s32.totalorder %s938_s19, %s934_s18 }
   0xa   : > { %s1219_s26 = smov (%p35_p0, %s33_s26), 0  ;;  %p56_p5 = scmp.eq.s32.totalorder %s731_s24, 0 }
   0xb   : > { %p1032_p4 = por %p50_p2, %p49_p1  ;;  %s37_s29 = ssub.s32 %s950_s22, %s1219_s26 }
   0xc   : > { %p185_p6 = scmp.eq.s32.totalorder %s731_s24, 1  ;;  %p40_p7 = scmp.eq.s32.totalorder %s37_s29, 0 }
   0xd   : > { %p1038_p8 = por %p56_p5, %p55_p3  ;;  %p191_p10 = scmp.eq.s32.totalorder %s732_s25, 1 }
   0xe   : > { %p1042_p9 = por %p185_p6, %p49_p1  ;;  %p738_p12 = scmp.ge.s32.totalorder %s954_s23, 2 }
   0xf   : > { %s1047_s7 = scalar_select %p40_p7, %s942_s20, %s42_s27  }
  0x10   : > { %p1049_p11 = por %p191_p10, %p55_p3  ;;  %p768_p13 = scmp.lt.s32.totalorder %s954_s23, 2 }
  0x11   : > { %s246_s9 = sand.u32 1, %s942_s20   ;;  %s754_s11 = sshll.u32 %s950_s22, 6 }
  0x12   : > { %s739_s10 = sshll.u32 %s246_s9, 6  ;;  %s258_s14 = scalar_lea.hbm %s1203_s0, %s754_s11 }
  0x13   : > { %s250_s15 = scalar_lea.vmem [#allocation2], %s739_s10  ;;  %s259_s17 = sshll.u32 %s258_s14, 4  ;;  %s260_s17 = int_to_ptr.hbm [resolvable:$true] %s259_s17 }
  0x14   : > { %s261_s16 = sshll.u32 %s250_s15, 4  ;;  %p761_p0 = pnand %p768_p13, %p1032_p4  ;;  %s262_s16 = int_to_ptr.vmem [resolvable:$true] %s261_s16 }
  0x15   : > { %p742_p1 = scmp.ge.s32.totalorder %s954_s23, 1  ;;  %s247_s24 = scalar_lea.sflag [#allocation3], %s246_s9 }
  0x16   : > { %s956_s25 = smov 256   ;;  %s957_s27 = smov 16  }
  0x17   : > { %763 = dma.hbm_to_vmem [thread:$0]  (!%p761_p0), %s260_s17, 1024, %s262_s16, %s247_s24, %s956_s25, %s956_s25, %s957_s27  }
  0x18   : > { %p269_p2 = scmp.lt.s32.totalorder %s954_s23, 3 }
  0x1a   : > { %p270_p3 = pnand %p742_p1, %p269_p2 }
  0x1b   : > { %s1065_s29 = sand.u32 (!%p270_p3), 1, %s938_s19  }
  0x1c   : > { %273 = sbr.rel (%p270_p3) target bundleno = 458 (0x1ca), region = 40  ;;  %s743_s10 = sshll.u32 (!%p270_p3), %s1065_s29, 6 }
  0x1d   : > { %s276_s11 = scalar_lea.sflag (!%p270_p3), [#allocation3], %s1065_s29  ;;  %s279_s28 = scalar_lea.vmem (!%p270_p3), [#allocation2], %s743_s10 }
  0x21   : > { %925 = dma.done.wait (%p1038_p8), %s276_s11, 1024  }
  0x22   : > { %927 = vsyncadd (%p1038_p8), %s276_s11, 4294966272  ;;  %v1075_v0 = vld [vmem:[%s279_s28 + $0x20] sm:$0xff]  ;;  %v1077_v1 = vld [vmem:[%s279_s28 + $0x28] sm:$0xff]  ;;  %vm392_vm0 = vcmask 15360   ;;  %s325_s16 = scalar_lea.vmem [#allocation5], %s743_s10  ;;  %s755_s17 = sshll.u32 %s946_s21, 6 }
  0x23   : > { %v1079_v2 = vld [vmem:[%s279_s28] sm:$0xff]  ;;  %v365_v3 = vadd.f32 %v1077_v1, %v1075_v0  ;;  %v1083_v4 = vld [vmem:[%s279_s28 + $0x8] sm:$0xff]  ;;  %v1087_v6 = vld [vmem:[%s279_s28 + $0x30] sm:$0xff]  ;;  %s583_s25 = scalar_lea.hbm %s1208_s5, %s755_s17  ;;  %s584_s27 = sshll.u32 %s325_s16, 4  ;;  %s585_s27 = int_to_ptr.vmem [resolvable:$true] %s584_s27 }
  0x24   : > { %v359_v5 = vadd.f32 %v1083_v4, %v1079_v2  ;;  %v1089_v7 = vld [vmem:[%s279_s28 + $0x38] sm:$0xff]  ;;  %v1091_v8 = vld [vmem:[%s279_s28 + $0x10] sm:$0xff]  ;;  %v375_v15 = vld [vmem:[%s1204_s1] sm:$0xff]  ;;  %s586_s11 = sshll.u32 %s583_s25, 4  ;;  %s892_s13 = scalar_lea.hbm %s1208_s5, 128  ;;  %s587_s11 = int_to_ptr.hbm [resolvable:$true] %s586_s11 }
  0x25   : > { %366 = vadd.xlane.f32.xlu1 %v365_v3  ;;  %v1093_v9 = vld [vmem:[%s279_s28 + $0x18] sm:$0xff]  ;;  %v368_v10 = vadd.f32 %v1089_v7, %v1087_v6  ;;  %v377_v12 = vld [vmem:[%s1204_s1 + $0x10] sm:$0xff]  ;;  %v376_v28 = vld [vmem:[%s1204_s1 + $0x8] sm:$0xff]  ;;  %s569_s28 = scalar_lea.sflag [#allocation4], %s1065_s29  ;;  %s886_s30 = sshra.s32 %s587_s11, 4  ;;  %s887_s30 = int_to_ptr.hbm [resolvable:$true] %s886_s30 }
  0x26   : > { %360 = vadd.xlane.f32.xlu0 %v359_v5  ;;  %v362_v11 = vadd.f32 %v1093_v9, %v1091_v8  ;;  %v378_v25 = vld [vmem:[%s1204_s1 + $0x18] sm:$0xff]  ;;  %v381_v43 = vld [vmem:[%s1205_s2 + $0x2] sm:$0x1]  ;;  %v379_v47 = vld [vmem:[%s1205_s2] sm:$0x1]  ;;  %s888_s21 = scalar_lea.hbm %s887_s30, 64  ;;  %p893_p7 = scmp.lt.s32.totalorder %s887_s30, %s1208_s5 }
  0x27   : > { %v385_v57 = vld [vmem:[%s1206_s3 + $0x10] sm:$0xff]  ;;  %v383_v60 = vld [vmem:[%s1206_s3] sm:$0xff]  ;;  %p889_p4 = scmp.ne.s32.totalorder %s887_s30, %s888_s21  ;;  %p894_p8 = scmp.lt.s32.totalorder %s892_s13, %s888_s21 }
  0x28   : > { %v382_v3 = vld [vmem:[%s1205_s2 + $0x3] sm:$0x1] }
  0x29   : > { %p890_p5 = pnand %p889_p4, %p1042_p9  ;;  %p895_p10 = por %p894_p8, %p893_p7 }
  0x2b   : > { %p891_p6 = pneg %p890_p5 }
  0x2d   : > { %369 = vadd.xlane.f32.xlu1 %v368_v10  ;;  %v380_v10 = vld [vmem:[%s1205_s2 + $0x1] sm:$0x1]  ;;  %p896_p13 = pnand %p895_p10, %p891_p6 }
  0x2e   : > { %363 = vadd.xlane.f32.xlu0 %v362_v11 }
  0x98   : > { %v367_v13 = vpop.xlane.xlu1 %366 }
  0x99   : > { %v373_v14 = vmul.f32 0.00390625, %v367_v13  ;;  %v361_v16 = vpop.xlane.xlu0 %360 }
  0x9a   : > { %v371_v17 = vmul.f32 0.00390625, %v361_v16 }
  0x9b   : > { %v462_v18 = vmul.f32 %v377_v12, %v373_v14 }
  0x9c   : > { %v391_v19 = vmul.f32 %v375_v15, %v371_v17 }
  0x9d   : > { %v463_v20 = vsel %vm392_vm0, %v462_v18, 0.0 }
  0x9e   : > { %v464_v21 = vrot.slane %v463_v20, 4  ;;  %v393_v22 = vsel %vm392_vm0, %v391_v19, 0.0 }
  0x9f   : > { %v394_v23 = vrot.slane %v393_v22, 4 }
  0xa0   : > { %v465_v24 = vadd.f32 %v464_v21, %v463_v20  ;;  %v370_v26 = vpop.xlane.xlu1 %369  ;;  %v386_v20 = vld [vmem:[%s1206_s3 + $0x18] sm:$0xff]  ;;  %v384_v21 = vld [vmem:[%s1206_s3 + $0x8] sm:$0xff] }
  0xa1   : > { %v395_v27 = vadd.f32 %v394_v23, %v393_v22  ;;  %v364_v29 = vpop.xlane.xlu0 %363  ;;  %v374_v30 = vmul.f32 0.00390625, %v370_v26 }
  0xa2   : > { %v466_v31 = vrot.slane %v465_v24, 2  ;;  %v372_v32 = vmul.f32 0.00390625, %v364_v29  ;;  %v389_v29 = vld [vmem:[%s1207_s4 + $0x10] sm:$0xff] }
  0xa3   : > { %v396_v33 = vrot.slane %v395_v27, 2  ;;  %v497_v34 = vmul.f32 %v378_v25, %v374_v30  ;;  %v387_v30 = vld [vmem:[%s1207_s4] sm:$0xff] }
  0xa4   : > { %v467_v35 = vadd.f32 %v466_v31, %v465_v24  ;;  %v427_v36 = vmul.f32 %v376_v28, %v372_v32  ;;  %v958_v28 = vmov 0  }
  0xa5   : > { %v397_v37 = vadd.f32 %v396_v33, %v395_v27  ;;  %v498_v38 = vsel %vm392_vm0, %v497_v34, 0.0  ;;  %825 = vset.pattern.permute.xlu1 %v958_v28  ;;  %823 = vset.pattern.permute.xlu2 %v958_v28 }
  0xa6   : > { %v428_v39 = vsel %vm392_vm0, %v427_v36, 0.0  ;;  %v499_v40 = vrot.slane %v498_v38, 4  ;;  %v468_v41 = vrot.slane %v467_v35, 1  ;;  %824 = vset.pattern.permute.xlu0 %v958_v28 }
  0xa7   : > { %v429_v42 = vrot.slane %v428_v39, 4  ;;  %v398_v44 = vrot.slane %v397_v37, 1 }
  0xa8   : > { %v500_v45 = vadd.f32 %v499_v40, %v498_v38  ;;  %v469_v46 = vadd.f32 %v468_v41, %v467_v35  ;;  %v388_v38 = vld [vmem:[%s1207_s4 + $0x8] sm:$0xff] }
  0xa9   : > { %v430_v48 = vadd.f32 %v429_v42, %v428_v39  ;;  %v399_v49 = vadd.f32 %v398_v44, %v397_v37  ;;  %v390_v37 = vld [vmem:[%s1207_s4 + $0x18] sm:$0xff] }
  0xaa   : > { %v501_v50 = vrot.slane %v500_v45, 2  ;;  %v470_v51 = vadd.f32 %v469_v46, %v381_v43 }
  0xab   : > { %v431_v52 = vrot.slane %v430_v48, 2  ;;  %v400_v53 = vadd.f32 %v399_v49, %v379_v47 }
  0xac   : > { %v502_v54 = vadd.f32 %v501_v50, %v500_v45  ;;  %v471_v55 = vmax.f32 %v470_v51, 0.0 }
  0xad   : > { %v432_v56 = vadd.f32 %v431_v52, %v430_v48  ;;  %v401_v58 = vmax.f32 %v400_v53, 0.0 }
  0xae   : > { %v472_v59 = vperm.slane %v471_v55, 0  ;;  %v503_v61 = vrot.slane %v502_v54, 1 }
  0xaf   : > { %v402_v62 = vperm.slane %v401_v58, 0  ;;  %v433_v63 = vrot.slane %v432_v56, 1 }
  0xb0   : > { %v473_v5 = vmul.f32 %v472_v59, %v385_v57  ;;  %v504_v11 = vadd.f32 %v503_v61, %v502_v54 }
  0xb1   : > { %v403_v12 = vmul.f32 %v402_v62, %v383_v60  ;;  %v434_v13 = vadd.f32 %v433_v63, %v432_v56 }
  0xb2   : > { %v474_v14 = vsel %vm392_vm0, %v473_v5, 0.0  ;;  %v505_v15 = vadd.f32 %v504_v11, %v382_v3 }
  0xb3   : > { %475 = vadd.xlane.f32.xlu0 %v474_v14  ;;  %v404_v16 = vsel %vm392_vm0, %v403_v12, 0.0  ;;  %v435_v17 = vadd.f32 %v434_v13, %v380_v10 }
  0xb4   : > { %405 = vadd.xlane.f32.xlu2 %v404_v16  ;;  %v506_v18 = vmax.f32 %v505_v15, 0.0 }
  0xb5   : > { %v436_v19 = vmax.f32 %v435_v17, 0.0 }
  0xb6   : > { %v507_v22 = vperm.slane %v506_v18, 0 }
  0xb7   : > { %v437_v23 = vperm.slane %v436_v19, 0 }
  0xb8   : > { %v508_v24 = vmul.f32 %v507_v22, %v386_v20 }
  0xb9   : > { %v438_v25 = vmul.f32 %v437_v23, %v384_v21 }
  0xba   : > { %v509_v26 = vsel %vm392_vm0, %v508_v24, 0.0 }
  0xbb   : > { %v439_v27 = vsel %vm392_vm0, %v438_v25, 0.0  ;;  %510 = vadd.xlane.f32.xlu1 %v509_v26 }
  0xbc   : > { %440 = vadd.xlane.f32.xlu2 %v439_v27 }
 0x126   : > { %v476_v31 = vpop.xlane.xlu0 %475 }
 0x127   : > { %v406_v32 = vpop.xlane.xlu2 %405  ;;  %v477_v33 = vadd.f32 %v476_v31, %v389_v29 }
 0x128   : > { %v407_v34 = vadd.f32 %v406_v32, %v387_v30 }
 0x129   : > { %v747_v35 = vmul.f32 -1.442695, %v477_v33 }
 0x12a   : > { %v745_v36 = vmul.f32 -1.442695, %v407_v34 }
 0x12b   : > { %826 = vpow2.f32 %v747_v35 }
 0x12c   : > { %828 = vpow2.f32 %v745_v36 }
 0x12e   : > { %v511_v39 = vpop.xlane.xlu1 %510 }
 0x12f   : > { %v441_v40 = vpop.xlane.xlu2 %440  ;;  %v512_v41 = vadd.f32 %v511_v39, %v390_v37 }
 0x130   : > { %v442_v42 = vadd.f32 %v441_v40, %v388_v38 }
 0x131   : > { %v827_v43 = vpop.eup %826  ;;  %v748_v44 = vmul.f32 -1.442695, %v512_v41 }
 0x132   : > { %v829_v45 = vpop.eup %828  ;;  %v481_v46 = vadd.f32 1.0, %v827_v43  ;;  %v746_v47 = vmul.f32 -1.442695, %v442_v42 }
 0x133   : > { %v411_v48 = vadd.f32 1.0, %v829_v45  ;;  %830 = vpow2.f32 %v748_v44 }
 0x134   : > { %832 = vrcp.f32 %v481_v46  ;;  %v491_v60 = vand.u32 2147483647, %v481_v46  ;;  %v493_v61 = vand.u32 2147483648, %v481_v46  ;;  %vm487_vm3 = vweird.f32 %v481_v46 }
 0x135   : > { %834 = vrcp.f32 %v411_v48  ;;  %v421_v59 = vand.u32 2147483647, %v411_v48  ;;  %v423_v62 = vand.u32 2147483648, %v411_v48  ;;  %vm417_vm4 = vweird.f32 %v411_v48 }
 0x136   : > { %836 = vpow2.f32 %v746_v47  ;;  %vm492_vm6 = vcmp.eq.f32.partialorder %v491_v60, 8.507059e+37  ;;  %v494_v12 = vor.u32 1.1754944e-38, %v493_v61 }
 0x137   : > { %vm422_vm8 = vcmp.eq.f32.partialorder %v421_v59, 8.507059e+37  ;;  %v424_v13 = vor.u32 1.1754944e-38, %v423_v62 }
 0x139   : > { %v831_v49 = vpop.eup %830 }
 0x13a   : > { %v833_v50 = vpop.eup %832  ;;  %v516_v51 = vadd.f32 1.0, %v831_v49 }
 0x13b   : > { %v835_v52 = vpop.eup %834  ;;  %v483_v53 = vmul.f32 %v833_v50, %v481_v46  ;;  %vm488_vm1 = vweird.f32 %v833_v50 }
 0x13c   : > { %v837_v54 = vpop.eup %836  ;;  %838 = vrcp.f32 %v516_v51  ;;  %v413_v55 = vmul.f32 %v835_v52, %v411_v48  ;;  %vm418_vm2 = vweird.f32 %v835_v52  ;;  %vm489_vm5 = vmor %vm487_vm3, %vm488_vm1  ;;  %vm522_vm9 = vweird.f32 %v516_v51 }
 0x13d   : > { %v446_v56 = vadd.f32 1.0, %v837_v54  ;;  %v484_v57 = vsub.f32 1.0, %v483_v53  ;;  %vm419_vm7 = vmor %vm417_vm4, %vm418_vm2  ;;  %v528_v18 = vand.u32 2147483648, %v516_v51  ;;  %v526_v22 = vand.u32 2147483647, %v516_v51 }
 0x13e   : > { %v414_v58 = vsub.f32 1.0, %v413_v55 }
 0x13f   : > { %840 = vrcp.f32 %v446_v56  ;;  %v485_v63 = vmul.f32 %v833_v50, %v484_v57  ;;  %v529_v26 = vor.u32 1.1754944e-38, %v528_v18  ;;  %v458_v27 = vand.u32 2147483648, %v446_v56 }
 0x140   : > { %v415_v3 = vmul.f32 %v835_v52, %v414_v58  ;;  %vm527_vm12 = vcmp.eq.f32.partialorder %v526_v22, 8.507059e+37  ;;  %v456_v30 = vand.u32 2147483647, %v446_v56  ;;  %vm452_vm14 = vweird.f32 %v446_v56 }
 0x141   : > { %v486_v5 = vadd.f32 %v833_v50, %v485_v63  ;;  %v459_v34 = vor.u32 1.1754944e-38, %v458_v27 }
 0x142   : > { %v839_v10 = vpop.eup %838  ;;  %v416_v11 = vadd.f32 %v835_v52, %v415_v3  ;;  %vm457_vm0 = vcmp.eq.f32.partialorder %v456_v30, 8.507059e+37 }
 0x143   : > { %v490_v14 = vsel %vm489_vm5, %v833_v50, %v486_v5  ;;  %v518_v15 = vmul.f32 %v839_v10, %v516_v51  ;;  %vm523_vm10 = vweird.f32 %v839_v10 }
 0x144   : > { %v420_v16 = vsel %vm419_vm7, %v835_v52, %v416_v11  ;;  %v495_v17 = vsel %vm492_vm6, %v494_v12, %v490_v14  ;;  %vm524_vm11 = vmor %vm522_vm9, %vm523_vm10 }
 0x145   : > { %v841_v19 = vpop.eup %840  ;;  %v425_v20 = vsel %vm422_vm8, %v424_v13, %v420_v16  ;;  %544 = vperm.xlu1 %825, %v495_v17   ;;  %v519_v21 = vsub.f32 1.0, %v518_v15 }
 0x146   : > { %534 = vperm.xlu2 %823, %v425_v20   ;;  %v448_v23 = vmul.f32 %v841_v19, %v446_v56  ;;  %vm453_vm13 = vweird.f32 %v841_v19 }
 0x147   : > { %v520_v24 = vmul.f32 %v839_v10, %v519_v21  ;;  %vm454_vm15 = vmor %vm452_vm14, %vm453_vm13 }
 0x148   : > { %v449_v25 = vsub.f32 1.0, %v448_v23 }
 0x149   : > { %v521_v28 = vadd.f32 %v839_v10, %v520_v24 }
 0x14a   : > { %v450_v29 = vmul.f32 %v841_v19, %v449_v25 }
 0x14b   : > { %v525_v31 = vsel %vm524_vm11, %v839_v10, %v521_v28 }
 0x14c   : > { %v451_v32 = vadd.f32 %v841_v19, %v450_v29  ;;  %v530_v33 = vsel %vm527_vm12, %v529_v26, %v525_v31 }
 0x14e   : > { %v455_v35 = vsel %vm454_vm15, %v841_v19, %v451_v32  ;;  %549 = vperm.xlu2 %823, %v530_v33  }
 0x14f   : > { %v460_v36 = vsel %vm457_vm0, %v459_v34, %v455_v35 }
 0x150   : > { %539 = vperm.xlu0 %824, %v460_v36  }
 0x1a0   : > { %v535_v37 = vpop.permute.xlu2 %534 }
 0x1a1   : > { %v552_v38 = vmul.f32 %v535_v37, %v1079_v2  ;;  %v553_v39 = vmul.f32 %v535_v37, %v1083_v4 }
 0x1a3   : > { %560 = vst [vmem:[%s325_s16] sm:$0xff] %v552_v38 }
 0x1a4   : > { %561 = vst [vmem:[%s325_s16 + $0x8] sm:$0xff] %v553_v39 }
 0x1a8   : > { %v550_v40 = vpop.permute.xlu2 %549 }
 0x1a9   : > { %v558_v41 = vmul.f32 %v550_v40, %v1087_v6  ;;  %v559_v42 = vmul.f32 %v550_v40, %v1089_v7 }
 0x1ab   : > { %566 = vst [vmem:[%s325_s16 + $0x30] sm:$0xff] %v558_v41 }
 0x1ac   : > { %567 = vst [vmem:[%s325_s16 + $0x38] sm:$0xff] %v559_v42 }
 0x1b7   : > { %v545_v43 = vpop.permute.xlu1 %544 }
 0x1b8   : > { %v556_v44 = vmul.f32 %v545_v43, %v1075_v0  ;;  %v557_v45 = vmul.f32 %v545_v43, %v1077_v1 }
 0x1ba   : > { %564 = vst [vmem:[%s325_s16 + $0x20] sm:$0xff] %v556_v44 }
 0x1bb   : > { %565 = vst [vmem:[%s325_s16 + $0x28] sm:$0xff] %v557_v45 }
 0x1c2   : > { %v540_v2 = vpop.permute.xlu0 %539 }
 0x1c3   : > { %v554_v4 = vmul.f32 %v540_v2, %v1091_v8  ;;  %v555_v6 = vmul.f32 %v540_v2, %v1093_v9 }
 0x1c5   : > { %562 = vst [vmem:[%s325_s16 + $0x10] sm:$0xff] %v554_v4 }
 0x1c6   : > { %563 = vst [vmem:[%s325_s16 + $0x18] sm:$0xff] %v555_v6 }
 0x1c7   : > { %899 = shalt.err (!%p896_p13)
}
 0x1c8   : > { %s959_s29 = smov 256   ;;  %s960_s16 = smov 16  }
 0x1c9   : > { %758 = dma.vmem_to_hbm [thread:$0]  (%p1042_p9), %s585_s27, 1024, %s587_s11, %s569_s28, %s959_s29, %s959_s29, %s960_s16  }
 0x1ca PF: > { %s601_s17 = sand.u32 1, %s934_s18   ;;  %p765_p0 = pnand %p738_p12, %p1049_p11 }
 0x1cb   : > { %s602_s24 = scalar_lea.sflag [#allocation4], %s601_s17 }
 0x1cc   : > { %p766_p1 = pneg %p765_p0 }
 0x1ce   : > { %929 = dma.done.wait (%p766_p1), %s602_s24, 1024  }
 0x1cf   : > { %931 = vsyncadd (%p766_p1), %s602_s24, 4294966272  ;;  %s21_s23 = sadd.s32 1, %s954_s23   ;;  %s1213_s18 = smov %s938_s19 }
 0x1d0   : > { %p18_p2 = scmp.ge.s32.totalorder %s21_s23, 4   ;;  %s1214_s19 = smov %s942_s20 }
 0x1d1   : > { %s1215_s20 = smov %s1047_s7  ;;  %s1216_s21 = smov %s950_s22 }
 0x1d2   : > { %s1217_s22 = smov %s1219_s26  ;;  %20 = sbr.rel (!%p18_p2) target bundleno = 6 (0x6), region = 97 }
 0x1d7   :  { %608 = vsyncpa [#allocation3], 1 }
 0x1d8   :  { %610 = vsyncpa [#allocation3 + $0x1], 1 }
 0x1d9   :  { %611 = vsyncpa [#allocation4], 1 }
 0x1da   :  { %613 = vsyncpa [#allocation4 + $0x1], 1 }

</bundles_post_ra>
